<compile_context>
chip_gen: v7x
topology: tpu7x:2x2x1
jax: 0.10.0
libtpu: 0.0.40
codegen_flags: <defaults>
</compile_context>

<pallas_src>
import functools

import jax
import jax.numpy as jnp
from jax.experimental import pallas as pl
from jax.experimental.pallas import tpu as pltpu

# ----------------------------- model dims (small) ----------------------------
X_SIZE = 16            # node feature size
H_SIZE = 32            # hidden size
N_CHILD = 3            # children of the internal (root) node
CONV_LEN = H_SIZE + 1  # Conv1d(k=2, stride=1, pad=1) output length
POOL_OUT = H_SIZE      # adaptive-max-pool output length (see TODO above)
N_STANCE = 4
N_VERACITY = 3
_VMEM_LIMIT = 4 * 1024 * 1024

# Verify the adjacent-pair-max equivalence against PyTorch's AdaptiveMaxPool1d
# bin rule: start_i = floor(i*L_in/L_out), end_i = ceil((i+1)*L_in/L_out).
for _i in range(POOL_OUT):
    _s = (_i * CONV_LEN) // POOL_OUT
    _e = ((_i + 1) * CONV_LEN + POOL_OUT - 1) // POOL_OUT
    assert (_s, _e) == (_i, _i + 2), "adaptive pool bins are not adjacent pairs"


# ----------------------------- Pallas kernels ---------------------------------
def leaf_node_kernel(xh_ref, w_ref, b_ref, wout_ref, bout_ref, out_ref):
    """Fused leaf update: gates + cell/hidden update + output head."""
    iou = jnp.dot(xh_ref[...], w_ref[...],
                  preferred_element_type=jnp.float32) + b_ref[...]
    g = jax.nn.sigmoid(iou)                                # i, o, u all sigmoid
    i_g = g[:, :H_SIZE]
    o_g = g[:, H_SIZE:2 * H_SIZE]
    u_g = g[:, 2 * H_SIZE:]
    c_new = i_g * u_g
    h_new = o_g * jnp.tanh(c_new)
    logits = jnp.dot(h_new, wout_ref[...],
                     preferred_element_type=jnp.float32) + bout_ref[...]
    out_ref[...] = jnp.concatenate([h_new, c_new, logits], axis=-1)


def internal_node_kernel(h_ref, c_ref, wcomb_ref, bcomb_ref,
                         uiou_ref, biou_ref, wout_ref, bout_ref, out_ref):
    """Fused internal-node update: forget gates + conv/pool + gates + head."""
    # One matmul computes both U_f(h_children) and Conv1d(h_children):
    #   res[:, :H]  -> U_f path,  res[:, H:] -> conv path (length H+1)
    res = jnp.dot(h_ref[...], wcomb_ref[...],
                  preferred_element_type=jnp.float32) + bcomb_ref[...]
    f = jax.nn.sigmoid(res[:, :H_SIZE])                    # (N, H)
    conv = res[:, H_SIZE:]                                 # (N, H+1)

    fc_sum = jnp.sum(f * c_ref[...], axis=0, keepdims=True)        # (1, H)

    # max over children commutes with the pool bins -> reduce children first
    conv_max = jnp.max(conv, axis=0, keepdims=True)                 # (1, H+1)
    # AdaptiveMaxPool1d(H) on length H+1 == max over adjacent pairs [i, i+2)
    h_hat = jnp.maximum(conv_max[:, :POOL_OUT], conv_max[:, 1:])    # (1, H)

    iou = jnp.dot(h_hat, uiou_ref[...],
                  preferred_element_type=jnp.float32) + biou_ref[...]
    g = jax.nn.sigmoid(iou)
    i_g = g[:, :H_SIZE]
    o_g = g[:, H_SIZE:2 * H_SIZE]
    u_g = g[:, 2 * H_SIZE:]
    c_new = i_g * u_g + fc_sum
    h_new = o_g * jnp.tanh(c_new)
    logits = jnp.dot(h_new, wout_ref[...],
                     preferred_element_type=jnp.float32) + bout_ref[...]
    out_ref[...] = jnp.concatenate([h_new, c_new, logits], axis=-1)


# ----------------------------- wrappers ---------------------------------------
def _full_spec(shape):
    zeros = (0,) * len(shape)

    def idx(i):
        return zeros

    return pl.BlockSpec(shape, idx)


def _compiler_params():
    return pltpu.CompilerParams(dimension_semantics=("arbitrary",),
                                vmem_limit_bytes=_VMEM_LIMIT)


def _run_fused(kernel, args, n_out):
    out_w = 2 * H_SIZE + n_out
    fused = pl.pallas_call(
        kernel,
        out_shape=jax.ShapeDtypeStruct((1, out_w), jnp.float32),
        grid=(1,),
        in_specs=[_full_spec(a.shape) for a in args],
        out_specs=pl.BlockSpec((1, out_w), lambda i: (0, 0)),
        compiler_params=_compiler_params(),
    )(*args)
    return fused[:, :H_SIZE], fused[:, H_SIZE:2 * H_SIZE], fused[:, 2 * H_SIZE:]


@functools.partial(jax.jit, static_argnames=("is_last",))
def leaf_forward(x, h_prev, params, is_last):
    """x: (1, X_SIZE), h_prev: (1, H_SIZE) -> (h_new, c_new, logits)."""
    w_cat = jnp.concatenate([params["w_iou"], params["u_iou"]], axis=0)
    xh = jnp.concatenate([x, h_prev], axis=-1)                       # (1, X+H)
    w_out = params["w_ver"] if is_last else params["w_st"]
    b_out = (params["b_ver"] if is_last else params["b_st"]).reshape(1, -1)
    args = (xh, w_cat, params["b_iou"], w_out, b_out)
    return _run_fused(leaf_node_kernel, args, w_out.shape[1])


@functools.partial(jax.jit, static_argnames=("is_last",))
def internal_forward(h_children, c_children, params, is_last):
    """h_children, c_children: (N, H_SIZE) -> (h_new, c_new, logits)."""
    # Express Conv1d(in=1, out=1, k=2, stride=1, pad=1) as a banded matmul:
    #   conv[:, t] = b + w0 * x_pad[t] + w1 * x_pad[t+1]
    w0 = params["conv_w"][0, 0, 0]
    w1 = params["conv_w"][0, 0, 1]
    j = jnp.arange(H_SIZE)
    conv_mat = (jnp.zeros((H_SIZE, CONV_LEN), jnp.float32)
                .at[j, j].set(w1)
                .at[j, j + 1].set(w0))
    w_comb = jnp.concatenate([params["u_f_w"], conv_mat], axis=1)     # (H, 2H+1)
    b_comb = jnp.concatenate(
        [params["u_f_b"].reshape(1, H_SIZE) + params["b_f"].reshape(1, H_SIZE),
         jnp.broadcast_to(params["conv_b"].reshape(1, 1), (1, CONV_LEN))],
        axis=1)                                                       # (1, 2H+1)

    w_out = params["w_ver"] if is_last else params["w_st"]
    b_out = (params["b_ver"] if is_last else params["b_st"]).reshape(1, -1)
    args = (h_children, c_children, w_comb, b_comb,
            params["u_iou"], params["b_iou"], w_out, b_out)
    return _run_fused(internal_node_kernel, args, w_out.shape[1])


# ----------------------------- pure-JAX reference -----------------------------
def _ref_head(h, p, is_last, prec):
    w_out = p["w_ver"] if is_last else p["w_st"]
    b_out = p["b_ver"] if is_last else p["b_st"]
    return jnp.dot(h, w_out, precision=prec) + b_out[None, :]


def _ref_leaf(x, h_prev, p, is_last):
    prec = jax.lax.Precision.HIGHEST
    iou = (jnp.dot(x, p["w_iou"], precision=prec)
           + jnp.dot(h_prev, p["u_iou"], precision=prec) + p["b_iou"])
    i_g = jax.nn.sigmoid(iou[:, :H_SIZE])
    o_g = jax.nn.sigmoid(iou[:, H_SIZE:2 * H_SIZE])
    u_g = jax.nn.sigmoid(iou[:, 2 * H_SIZE:])
    c = i_g * u_g
    h = o_g * jnp.tanh(c)
    return h, c, _ref_head(h, p, is_last, prec)


def _ref_internal(h_ch, c_ch, p, is_last):
    prec = jax.lax.Precision.HIGHEST
    u_f = jnp.dot(h_ch, p["u_f_w"], precision=prec) + p["u_f_b"][None, :]
    f = jax.nn.sigmoid(u_f + p["b_f"])
    xp = jnp.pad(h_ch, ((0, 0), (1, 1)))
    w0, w1 = p["conv_w"][0, 0, 0], p["conv_w"][0, 0, 1]
    conv = w0 * xp[:, :-1] + w1 * xp[:, 1:] + p["conv_b"][0]          # (N, H+1)
    cols = []
    for i in range(POOL_OUT):                       # PyTorch adaptive-pool bins
        s = (i * CONV_LEN) // POOL_OUT
        e = ((i + 1) * CONV_LEN + POOL_OUT - 1) // POOL_OUT
        cols.append(jnp.max(conv[:, s:e], axis=1))
    pooled = jnp.stack(cols, axis=1)                                  # (N, POOL)
    h_hat = jnp.max(pooled, axis=0, keepdims=True)                    # (1, POOL)
    iou = jnp.dot(h_hat, p["u_iou"], precision=prec) + p["b_iou"]
    i_g = jax.nn.sigmoid(iou[:, :H_SIZE])
    o_g = jax.nn.sigmoid(iou[:, H_SIZE:2 * H_SIZE])
    u_g = jax.nn.sigmoid(iou[:, 2 * H_SIZE:])
    c = i_g * u_g + jnp.sum(f * c_ch, axis=0, keepdims=True)
    h = o_g * jnp.tanh(c)
    return h, c, _ref_head(h, p, is_last, prec)


# ----------------------------- params & tree ----------------------------------
def init_params(key):
    ks = jax.random.split(key, 12)

    def nrm(k, shape, scale=0.1):
        return (scale * jax.random.normal(k, shape)).astype(jnp.float32)

    return {
        "w_iou": nrm(ks[0], (X_SIZE, 3 * H_SIZE)),    # W_iou (no bias)
        "u_iou": nrm(ks[1], (H_SIZE, 3 * H_SIZE)),    # U_iou (no bias)
        "b_iou": nrm(ks[2], (1, 3 * H_SIZE)),
        "u_f_w": nrm(ks[3], (H_SIZE, H_SIZE)),        # U_f weight
        "u_f_b": nrm(ks[4], (H_SIZE,)),               # U_f bias
        "b_f":   nrm(ks[5], (1, H_SIZE)),
        "conv_w": nrm(ks[6], (1, 1, 2), scale=1.0),   # Conv1d(1,1,2) weight
        "conv_b": nrm(ks[7], (1,)),                   # Conv1d bias
        "w_st": nrm(ks[8], (H_SIZE, N_STANCE)),
        "b_st": nrm(ks[9], (N_STANCE,)),
        "w_ver": nrm(ks[10], (H_SIZE, N_VERACITY)),
        "b_ver": nrm(ks[11], (N_VERACITY,)),
    }


class _Node:
    def __init__(self, x=None, children=None):
        self.x = x
        self.children = children
        self.h = None
        self.c = None


# ----------------------------- main -------------------------------------------
if __name__ == "__main__":
    key = jax.random.PRNGKey(0)
    k_param, k_x = jax.random.split(key)
    params = init_params(k_param)

    # Tree: N_CHILD leaves under one root; veracity is produced at the root.
    xs = jax.random.normal(k_x, (N_CHILD, 1, X_SIZE), dtype=jnp.float32)
    leaves = [_Node(x=xs[i]) for i in range(N_CHILD)]
    root = _Node(children=leaves)

    # ---- Pallas forward (stateful traversal, mirroring the PyTorch module) ----
    h_state = jnp.zeros((1, H_SIZE), jnp.float32)
    c_state = jnp.zeros((1, H_SIZE), jnp.float32)
    stances = []
    for leaf in leaves:
        h_state, c_state, stance = leaf_forward(leaf.x, h_state, params,
                                                is_last=False)
        leaf.h, leaf.c = h_state, c_state
        stances.append(stance)

    h_children = jnp.concatenate([ch.h for ch in root.children], axis=0)
    c_children = jnp.concatenate([ch.c for ch in root.children], axis=0)
    h_state, c_state, veracity = internal_forward(h_children, c_children,
                                                  params, is_last=True)
    veracity = jax.block_until_ready(veracity)

    # ---- pure-JAX reference of the same traversal -----------------------------
    rh = jnp.zeros((1, H_SIZE), jnp.float32)
    ref_hs, ref_cs, ref_stances = [], [], []
    for i in range(N_CHILD):
        rh, rc, st = _ref_leaf(xs[i], rh, params, is_last=False)
        ref_hs.append(rh)
        ref_cs.append(rc)
        ref_stances.append(st)
    r_h, r_c, r_ver = _ref_internal(jnp.concatenate(ref_hs, axis=0),
                                    jnp.concatenate(ref_cs, axis=0),
                                    params, is_last=True)

    assert stances[0].shape == (1, N_STANCE)
    assert veracity.shape == (1, N_VERACITY)
    checks = [(h_state, r_h), (c_state, r_c), (veracity, r_ver)]
    checks += list(zip(stances, ref_stances))
    for got, ref in checks:
        assert jnp.allclose(got, ref, rtol=1e-3, atol=1e-3), (got, ref)

    print("KERNEL_OK")
</pallas_src>

<mosaic_0001>
module attributes {stable_mosaic.version = 11 : i64} {
  func.func @leaf_node_kernel(%arg0: i32, %arg1: memref<1x48xf32, #tpu.memory_space<vmem>>, %arg2: memref<48x96xf32, #tpu.memory_space<vmem>>, %arg3: memref<1x96xf32, #tpu.memory_space<vmem>>, %arg4: memref<32x4xf32, #tpu.memory_space<vmem>>, %arg5: memref<1x4xf32, #tpu.memory_space<vmem>>, %arg6: memref<1x68xf32, #tpu.memory_space<vmem>>) attributes {dimension_semantics = [#tpu.dimension_semantics<arbitrary>], iteration_bounds = array<i64: 1>, scalar_prefetch = 0 : i64, scratch_operands = 0 : i64, tpu.core_type = #tpu.core_type<tc>, window_params = [{pipeline_mode = #tpu.pipeline_mode<synchronous>, transform_indices = @transform_0, window_bounds = array<i64: 1, 48>}, {pipeline_mode = #tpu.pipeline_mode<synchronous>, transform_indices = @transform_1, window_bounds = array<i64: 48, 96>}, {pipeline_mode = #tpu.pipeline_mode<synchronous>, transform_indices = @transform_2, window_bounds = array<i64: 1, 96>}, {pipeline_mode = #tpu.pipeline_mode<synchronous>, transform_indices = @transform_3, window_bounds = array<i64: 32, 4>}, {pipeline_mode = #tpu.pipeline_mode<synchronous>, transform_indices = @transform_4, window_bounds = array<i64: 1, 4>}, {pipeline_mode = #tpu.pipeline_mode<synchronous>, transform_indices = @transform_5, window_bounds = array<i64: 1, 68>}]} {
    %c0 = arith.constant 0 : index
    %c0_0 = arith.constant 0 : index
    %0 = vector.load %arg1[%c0, %c0_0] : memref<1x48xf32, #tpu.memory_space<vmem>>, vector<1x48xf32>
    %c0_1 = arith.constant 0 : index
    %c0_2 = arith.constant 0 : index
    %1 = vector.load %arg2[%c0_1, %c0_2] : memref<48x96xf32, #tpu.memory_space<vmem>>, vector<48x96xf32>
    %cst = arith.constant dense<0.000000e+00> : vector<1x96xf32>
    %2 = tpu.matmul %0, %1, %cst {dimension_numbers = #tpu.dot_dimension_numbers<[1], [0], [0], [1], [0, 0, 1, 1], [], []>} : vector<1x48xf32>, vector<48x96xf32>, vector<1x96xf32> -> vector<1x96xf32>
    %c0_3 = arith.constant 0 : index
    %c0_4 = arith.constant 0 : index
    %3 = vector.load %arg3[%c0_3, %c0_4] : memref<1x96xf32, #tpu.memory_space<vmem>>, vector<1x96xf32>
    %4 = arith.addf %2, %3 : vector<1x96xf32>
    %5 = arith.negf %4 : vector<1x96xf32>
    %6 = math.exp %5 : vector<1x96xf32>
    %cst_5 = arith.constant 1.000000e+00 : f32
    %7 = vector.broadcast %cst_5 : f32 to vector<1x96xf32>
    %8 = arith.addf %7, %6 : vector<1x96xf32>
    %9 = arith.divf %7, %8 : vector<1x96xf32>
    %10 = vector.extract_strided_slice %9 {offsets = [0, 0], sizes = [1, 32], strides = [1, 1]} : vector<1x96xf32> to vector<1x32xf32>
    %11 = vector.extract_strided_slice %9 {offsets = [0, 32], sizes = [1, 32], strides = [1, 1]} : vector<1x96xf32> to vector<1x32xf32>
    %12 = vector.extract_strided_slice %9 {offsets = [0, 64], sizes = [1, 32], strides = [1, 1]} : vector<1x96xf32> to vector<1x32xf32>
    %13 = arith.mulf %10, %12 : vector<1x32xf32>
    %14 = math.tanh %13 : vector<1x32xf32>
    %15 = arith.mulf %11, %14 : vector<1x32xf32>
    %c0_6 = arith.constant 0 : index
    %c0_7 = arith.constant 0 : index
    %16 = vector.load %arg4[%c0_6, %c0_7] : memref<32x4xf32, #tpu.memory_space<vmem>>, vector<32x4xf32>
    %cst_8 = arith.constant dense<0.000000e+00> : vector<1x4xf32>
    %17 = tpu.matmul %15, %16, %cst_8 {dimension_numbers = #tpu.dot_dimension_numbers<[1], [0], [0], [1], [0, 0, 1, 1], [], []>} : vector<1x32xf32>, vector<32x4xf32>, vector<1x4xf32> -> vector<1x4xf32>
    %c0_9 = arith.constant 0 : index
    %c0_10 = arith.constant 0 : index
    %18 = vector.load %arg5[%c0_9, %c0_10] : memref<1x4xf32, #tpu.memory_space<vmem>>, vector<1x4xf32>
    %19 = arith.addf %17, %18 : vector<1x4xf32>
    %20 = tpu.concatenate %15, %13, %19 in 1 : vector<1x32xf32>, vector<1x32xf32>, vector<1x4xf32> -> vector<1x68xf32>
    %c0_11 = arith.constant 0 : index
    %c0_12 = arith.constant 0 : index
    %21 = vector.load %arg6[%c0_11, %c0_12] : memref<1x68xf32, #tpu.memory_space<vmem>>, vector<1x68xf32>
    tpu.vector_store %arg6[%c0_11, %c0_12], %20 {strides = array<i32>} : memref<1x68xf32, #tpu.memory_space<vmem>>, vector<1x68xf32>,
    return
  }
  func.func @transform_0(%arg0: i32) -> (i32, i32) {
    %c0_i32 = arith.constant 0 : i32
    %c0_i32_0 = arith.constant 0 : i32
    %c0_i32_1 = arith.constant 0 : i32
    return %c0_i32, %c0_i32_0 : i32, i32
  }
  func.func @transform_1(%arg0: i32) -> (i32, i32) {
    %c0_i32 = arith.constant 0 : i32
    %c0_i32_0 = arith.constant 0 : i32
    %c0_i32_1 = arith.constant 0 : i32
    return %c0_i32, %c0_i32_0 : i32, i32
  }
  func.func @transform_2(%arg0: i32) -> (i32, i32) {
    %c0_i32 = arith.constant 0 : i32
    %c0_i32_0 = arith.constant 0 : i32
    %c0_i32_1 = arith.constant 0 : i32
    return %c0_i32, %c0_i32_0 : i32, i32
  }
  func.func @transform_3(%arg0: i32) -> (i32, i32) {
    %c0_i32 = arith.constant 0 : i32
    %c0_i32_0 = arith.constant 0 : i32
    %c0_i32_1 = arith.constant 0 : i32
    return %c0_i32, %c0_i32_0 : i32, i32
  }
  func.func @transform_4(%arg0: i32) -> (i32, i32) {
    %c0_i32 = arith.constant 0 : i32
    %c0_i32_0 = arith.constant 0 : i32
    %c0_i32_1 = arith.constant 0 : i32
    return %c0_i32, %c0_i32_0 : i32, i32
  }
  func.func @transform_5(%arg0: i32) -> (i32, i32) {
    %c0_i32 = arith.constant 0 : i32
    %c0_i32_0 = arith.constant 0 : i32
    %c0_i32_1 = arith.constant 0 : i32
    return %c0_i32, %c0_i32_0 : i32, i32
  }
}

</mosaic_0001>

<bundles_post_ra>
// kernel: leaf_forward.1
= control target key start
LH: loop header
LB: loop body
LE: loop exit
PB: predicated region body
PF: predicated region fallthrough
CT: control target
= control target key end

     0   :  { %v286_v0 = vmov 0.0|0.0   ;;  %vm287_vm0 = vmmov 0   ;;  %v288_v4 = vmov 0.0   ;;  %vm28_vm1 = vcmask 392192   ;;  %s290_s15 = smov 32   ;;  %s291_s16 = smov 96   ;;  %s366_s1 = inlined_call_operand.vmem [shape: f32[48,96], index: 1, kind: input, shape index: {}]   ;;  %s367_s0 = inlined_call_operand.vmem [shape: f32[1,48], index: 0, kind: input, shape index: {}]   ;;  %s368_s2 = inlined_call_operand.vmem [shape: f32[1,96], index: 2, kind: input, shape index: {}]   ;;  %s369_s3 = inlined_call_operand.vmem [shape: f32[32,4], index: 3, kind: input, shape index: {}]   ;;  %s370_s4 = inlined_call_operand.vmem [shape: f32[1,4], index: 4, kind: input, shape index: {}]   ;;  %s371_s5 = inlined_call_operand.vmem [shape: f32[1,68], index: 5, kind: output, shape index: {}]  }
   0x1   :  { %259 = vmatprep.subr.bf16.mxu0 %v286_v0  ;;  %v21_v1 = vld [vmem:[%s366_s1] sm:$0xff]  ;;  %v22_v2 = vld [vmem:[%s366_s1 + $0x8] sm:$0xff]  ;;  %v23_v3 = vld [vmem:[%s366_s1 + $0x10] sm:$0xff]  ;;  %245 = vmatprep.mubr.msk.f32.mxu0 %vm287_vm0, %v288_v4  ;;  %vm127_vm2 = vcmask 261120   ;;  %vm210_vm3 = vcmask 523264   ;;  %vm212_vm4 = vcmask 548864  }
   0x2   :  { %v260_v5 = vpack.c.bf16 %v22_v2, %v21_v1  ;;  %v24_v6 = vld [vmem:[%s366_s1 + $0x18] sm:$0xff]  ;;  %268 = vmatprep.subr.bf16.mxu1 %v286_v0  ;;  %256 = vmatprep.mubr.msk.f32.mxu1 %vm287_vm0, %v288_v4  ;;  %v25_v8 = vld [vmem:[%s366_s1 + $0x20] sm:$0xff]  ;;  %v26_v9 = vld [vmem:[%s366_s1 + $0x28] sm:$0xff]  ;;  %s289_s1 = smov 64  }
   0x3   :  { %v263_v7 = vpack.c.bf16 %v24_v6, %v23_v3  ;;  %v266_v10 = vpack.c.bf16 %v26_v9, %v25_v8  ;;  %v20_v11 = vld [vmem:[%s367_s0] sm:$0x1]  ;;  %v120_v23 = vld [vmem:[%s369_s3 + $0x8] sm:$0xff]  ;;  %v121_v24 = vld [vmem:[%s369_s3 + $0x10] sm:$0xff] }
   0x4   :  { %261 = vmatpush3.bf16.msra.mxu0 %v260_v5  ;;  %v27_v12 = vld [vmem:[%s368_s2] sm:$0x1]  ;;  %v122_v26 = vld [vmem:[%s369_s3 + $0x18] sm:$0xff] }
   0x5   :  { %262 = vmatprep.subr.bf16.mxu0 %v286_v0  ;;  %v119_v22 = vld [vmem:[%s369_s3] sm:$0xff]  ;;  %v272_v27 = vpack.c.bf16 %v122_v26, %v121_v24 }
   0x6   :  { %v269_v25 = vpack.c.bf16 %v120_v23, %v119_v22  ;;  %v123_v34 = vld [vmem:[%s370_s4] sm:$0x1] }
   0x8   :  { %264 = vmatpush3.bf16.msra.mxu0 %v263_v7  ;;  %270 = vmatpush3.bf16.msra.mxu1 %v269_v25 }
   0x9   :  { %265 = vmatprep.subr.bf16.mxu0 %v286_v0  ;;  %271 = vmatprep.subr.bf16.mxu1 %v286_v0 }
   0xc   :  { %267 = vmatpush3.bf16.msra.mxu0 %v266_v10  ;;  %273 = vmatpush3.bf16.msra.mxu1 %v272_v27 }
   0xf   :  { %246 = vmatmul.mubr.msk.f32.vlgmr.msra.gmra.mrb[0].mxu0 %vm28_vm1, %v20_v11 }
  0xe2   :  { %v98_v13 = vpop.f32.mrb[0].mxu0 }
  0xe3   :  { %v99_v14 = vadd.f32 %v98_v13, %v27_v12  ;;  %v247_v15 = vpop.f32.mrb[1].mxu0 }
  0xe5   :  { %v219_v16 = vmul.f32 -1.442695, %v99_v14 }
  0xe7   :  { %280 = vpow2.f32 %v219_v16 }
  0xf1   :  { %v281_v17 = vpop.eup %280 }
  0xf2   :  { %v105_v18 = vadd.f32 1.0, %v281_v17 }
  0xf4   :  { %282 = vrcp.f32 %v105_v18 }
  0xfe   :  { %v283_v19 = vpop.eup %282 }
  0xff   :  { %109 = vrot.lane.b32.xlu0 %v283_v19, %s289_s1 }
 0x171   :  { %v110_v20 = vpop.permute.xlu0 %109 }
 0x172   :  { %v112_v21 = vmul.f32 %v283_v19, %v110_v20 }
 0x174   :  { %284 = vtanh.f32 %v112_v21 }
 0x17e   :  { %v285_v28 = vpop.eup %284 }
 0x17f   :  { %115 = vrot.lane.b32.xlu0 %v285_v28, %s290_s15 }
 0x1f1   :  { %v116_v29 = vpop.permute.xlu0 %115 }
 0x1f2   :  { %v118_v30 = vmul.f32 %v283_v19, %v116_v29 }
 0x1f4   :  { %125 = vrot.lane.b32.xlu1 %v118_v30, %s291_s16 }
 0x1f8   :  { %202 = vrot.lane.b32.xlu1 %v112_v21, %s290_s15 }
 0x266   :  { %v126_v31 = vpop.permute.xlu1 %125 }
 0x267   :  { %257 = vmatmul.mubr.msk.f32.vlgmr.msra.gmra.mrb[0].mxu1 %vm127_vm2, %v126_v31 }
 0x26a   :  { %v203_v32 = vpop.permute.xlu1 %202 }
 0x26b   :  { %v209_v33 = vsel %vm127_vm2, %v126_v31, %v203_v32 }
 0x33a   :  { %v196_v35 = vpop.f32.mrb[0].mxu1 }
 0x33b   :  { %v197_v36 = vadd.f32 %v196_v35, %v123_v34  ;;  %v258_v37 = vpop.f32.mrb[1].mxu1 }
 0x33d   :  { %206 = vrot.lane.b32.xlu0 %v197_v36, %s289_s1 }
 0x3af   :  { %v207_v38 = vpop.permute.xlu0 %206 }
 0x3b0   :  { %v211_v39 = vsel %vm210_vm3, %v209_v33, %v207_v38 }
 0x3b1   :  { %213 = vst.msk [vmem:[%s371_s5] sm:$0x1] %vm212_vm4, %v211_v39 }

</bundles_post_ra>
